<compile_context>
chip_gen: v7x
topology: tpu7x:2x2x1
jax: 0.10.0
libtpu: 0.0.40
codegen_flags: <defaults>
</compile_context>

<pallas_src>
import functools
import math

import jax
import jax.numpy as jnp
from jax.experimental import pallas as pl
from jax.experimental.pallas import tpu as pltpu


def _round_up(x, m):
    return ((x + m - 1) // m) * m


def _device_budget():
    """Per-generation VMEM budget and default tile sizes."""
    vmem_cap = None
    try:
        info = pltpu.get_tpu_info()
        vmem_cap = getattr(info, "vmem_capacity_bytes", None)
    except Exception:
        vmem_cap = None
    if vmem_cap is None:
        vmem_cap = 64 * 1024 * 1024                  # assume v7x-like (smallest)
    if vmem_cap >= 100 * 1024 * 1024:                # v5e / v6e: 128 MiB physical
        return 96 * 1024 * 1024, 256, 512
    # v7x: 64 MiB per TensorCore -> keep pipelining headroom
    return 48 * 1024 * 1024, 128, 256


# --------------------------------------------------------------------------- #
# Stage 1: Q / K / V projections (each sequence tile projected exactly once)  #
# --------------------------------------------------------------------------- #
def _qkv_proj_kernel(x_ref, wq_ref, wk_ref, wv_ref, q_ref, k_ref, v_ref):
    x = x_ref[...]
    q_ref[...] = jnp.dot(x, wq_ref[...],
                         preferred_element_type=jnp.float32).astype(q_ref.dtype)
    k_ref[...] = jnp.dot(x, wk_ref[...],
                         preferred_element_type=jnp.float32).astype(k_ref.dtype)
    v_ref[...] = jnp.dot(x, wv_ref[...],
                         preferred_element_type=jnp.float32).astype(v_ref.dtype)


# --------------------------------------------------------------------------- #
# Stage 2: flash attention over the precomputed Q / K / V                     #
# --------------------------------------------------------------------------- #
def _flash_attn_kernel(q_ref, k_ref, v_ref, o_ref, m_scr, l_scr, acc_scr,
                       *, block_k, seq_len, padded, stat_w, compute_dtype,
                       approx_recip):
    ki = pl.program_id(2)

    # ---- init (once per q-tile): reset running stats / accumulator ----
    @pl.when(ki == 0)
    def _init():
        m_scr[...] = jnp.full_like(m_scr, -1e30)
        l_scr[...] = jnp.zeros_like(l_scr)
        acc_scr[...] = jnp.zeros_like(acc_scr)

    def rep(stat, width):
        # Broadcast a lane-replicated (tq, stat_w) row statistic to `width` lanes.
        if stat_w == 1 or width == stat_w:
            return stat                       # (tq, 1) relies on implicit broadcast
        return jnp.tile(stat, (1, width // stat_w))

    def step(apply_mask):
        # scores: contract Q and K on the feature axis directly (no K^T copy)
        s = jax.lax.dot_general(
            q_ref[...], k_ref[...],
            dimension_numbers=(((1,), (1,)), ((), ())),
            preferred_element_type=jnp.float32)                      # (tq, tk) f32
        if apply_mask:  # static: only emitted for the single boundary tile
            col = jax.lax.broadcasted_iota(jnp.int32, s.shape, 1) + ki * block_k
            s = jnp.where(col < seq_len, s, -1e30)

        # online softmax update (all elementwise / exp math stays in f32)
        m_prev = m_scr[...]
        m_new = jnp.maximum(m_prev, jnp.max(s, axis=-1, keepdims=True))
        alpha = jnp.exp(m_prev - m_new)
        p = jnp.exp(s - rep(m_new, s.shape[-1]))                     # (tq, tk) f32
        l_scr[...] = alpha * l_scr[...] + jnp.sum(p, axis=-1, keepdims=True)
        pv = jnp.dot(p.astype(compute_dtype), v_ref[...],
                     preferred_element_type=jnp.float32)             # (tq, dv_p)
        acc_scr[...] = rep(alpha, acc_scr.shape[-1]) * acc_scr[...] + pv
        m_scr[...] = m_new

    if not padded:
        step(apply_mask=False)
    else:
        n_full = seq_len // block_k           # number of fully-valid kv tiles
        @pl.when(ki < n_full)
        def _full_tiles():
            step(apply_mask=False)            # no mask cost on interior tiles
        if seq_len % block_k:                 # one partially-valid boundary tile
            @pl.when(ki == n_full)
            def _boundary_tile():
                step(apply_mask=True)
        # ki > boundary: tile is 100% padding -> skipped entirely

    # ---- finalize (last kv tile): normalize once per q-tile and store ----
    @pl.when(ki == pl.num_programs(2) - 1)
    def _finalize():
        inv_l = pl.reciprocal(l_scr[...], approx=approx_recip)
        o_ref[...] = (acc_scr[...] * rep(inv_l, o_ref.shape[-1])).astype(o_ref.dtype)


# --------------------------------------------------------------------------- #
# Wrapper                                                                     #
# --------------------------------------------------------------------------- #
def self_attention(x, wq, wk, wv, *, block_q=None, block_k=None,
                   compute_dtype=jnp.bfloat16):
    """x: (B, N, D_in); wq/wk: (D_in, Dq); wv: (D_in, Dv). Returns (B, N, Dv)."""
    B, N, D_in = x.shape
    Dq = wq.shape[1]
    Dv = wv.shape[1]
    norm_fact = 1.0 / math.sqrt(Dq)           # dim_k == dim_q in the torch module

    vmem_limit, def_bq, def_bk = _device_budget()
    bq = block_q if block_q is not None else def_bq
    bk = block_k if block_k is not None else def_bk

    # lane-dense feature dims: zero-pad Dq / Dv to multiples of 128 (exact math;
    # padded columns are zero and sliced off at the end)
    dq_p = _round_up(Dq, 128)
    dv_p = _round_up(Dv, 128)

    # --- sequence tiling (collapses to a single tile for small N) ---
    tq = min(bq, _round_up(N, 8))
    tk = min(bk, _round_up(N, 8))

    # v7x megacore balance: ensure >= 2 independent (batch, q-tile) work items.
    while B * ((N + tq - 1) // tq) < 2:
        new_tq = _round_up(tq // 2, 8)
        if new_tq == tq:
            break
        tq = new_tq

    # Re-derive the flash-stage VMEM working set (double-buffered inputs +
    # output + f32 accumulator/stats) and shrink tiles until it fits the budget.
    cbytes = jnp.dtype(compute_dtype).itemsize
    obytes = jnp.dtype(x.dtype).itemsize

    def working_set(tq_, tk_):
        inputs = 2 * (tq_ * dq_p + tk_ * dq_p + tk_ * dv_p) * cbytes
        outputs = 2 * tq_ * dv_p * obytes
        scratch = (tq_ * dv_p + 2 * tq_ * 128) * 4
        return inputs + outputs + scratch

    while working_set(tq, tk) > 0.8 * vmem_limit and tk > 128:
        tk = max(128, _round_up(tk // 2, 8))
    while working_set(tq, tk) > 0.8 * vmem_limit and tq > 128:
        tq = max(128, _round_up(tq // 2, 8))

    # Keep lcm(tq, tk) small (minimal sequence padding): make one a multiple of
    # the other.
    if tq != tk:
        if tk > tq:
            tk = (tk // tq) * tq
        else:
            tq = (tq // tk) * tk

    n_pad = _round_up(N, math.lcm(tq, tk))
    padded = n_pad != N

    # lane-dense running stats when the kv tile (and dv_p) are 128-aligned
    stat_w = 128 if tk % 128 == 0 else 1

    # --- pad / cast inputs; fold the softmax scale into Wq (free) ---
    xd = x.astype(compute_dtype)
    if padded:
        xd = jnp.pad(xd, ((0, 0), (0, n_pad - N), (0, 0)))
    wq_p = jnp.pad(wq * norm_fact, ((0, 0), (0, dq_p - Dq))).astype(compute_dtype)
    wk_p = jnp.pad(wk, ((0, 0), (0, dq_p - Dq))).astype(compute_dtype)
    wv_p = jnp.pad(wv, ((0, 0), (0, dv_p - Dv))).astype(compute_dtype)

    # ---------------- stage 1: Q/K/V projections (computed exactly once) ------
    tp = max(tq, tk)                           # n_pad is a multiple of both
    q, k, v = pl.pallas_call(
        _qkv_proj_kernel,
        out_shape=(
            jax.ShapeDtypeStruct((B, n_pad, dq_p), compute_dtype),
            jax.ShapeDtypeStruct((B, n_pad, dq_p), compute_dtype),
            jax.ShapeDtypeStruct((B, n_pad, dv_p), compute_dtype),
        ),
        grid_spec=pltpu.PrefetchScalarGridSpec(
            num_scalar_prefetch=0,
            grid=(B, n_pad // tp),
            in_specs=[
                pl.BlockSpec((None, tp, D_in), lambda b, i: (b, i, 0)),
                pl.BlockSpec((D_in, dq_p), lambda b, i: (0, 0)),      # Wq*scale
                pl.BlockSpec((D_in, dq_p), lambda b, i: (0, 0)),      # Wk
                pl.BlockSpec((D_in, dv_p), lambda b, i: (0, 0)),      # Wv
            ],
            out_specs=[
                pl.BlockSpec((None, tp, dq_p), lambda b, i: (b, i, 0)),
                pl.BlockSpec((None, tp, dq_p), lambda b, i: (b, i, 0)),
                pl.BlockSpec((None, tp, dv_p), lambda b, i: (b, i, 0)),
            ],
        ),
        compiler_params=pltpu.CompilerParams(
            dimension_semantics=("parallel", "parallel"),
            vmem_limit_bytes=vmem_limit,
        ),
    )(xd, wq_p, wk_p, wv_p)

    # ---------------- stage 2: flash attention --------------------------------
    kernel = functools.partial(
        _flash_attn_kernel,
        block_k=tk, seq_len=N, padded=padded, stat_w=stat_w,
        compute_dtype=compute_dtype,
        approx_recip=(compute_dtype != jnp.float32),
    )

    out = pl.pallas_call(
        kernel,
        out_shape=jax.ShapeDtypeStruct((B, n_pad, dv_p), x.dtype),
        grid_spec=pltpu.PrefetchScalarGridSpec(
            num_scalar_prefetch=0,
            grid=(B, n_pad // tq, n_pad // tk),
            in_specs=[
                pl.BlockSpec((None, tq, dq_p), lambda b, qi, ki: (b, qi, 0)),  # Q
                pl.BlockSpec((None, tk, dq_p), lambda b, qi, ki: (b, ki, 0)),  # K
                pl.BlockSpec((None, tk, dv_p), lambda b, qi, ki: (b, ki, 0)),  # V
            ],
            out_specs=pl.BlockSpec((None, tq, dv_p), lambda b, qi, ki: (b, qi, 0)),
            scratch_shapes=[
                pltpu.VMEM((tq, stat_w), jnp.float32),   # running max  m
                pltpu.VMEM((tq, stat_w), jnp.float32),   # running denom l
                pltpu.VMEM((tq, dv_p), jnp.float32),     # output accumulator
            ],
        ),
        compiler_params=pltpu.CompilerParams(
            dimension_semantics=("parallel", "parallel", "arbitrary"),
            vmem_limit_bytes=vmem_limit,
        ),
    )(q, k, v)

    # Drop sequence padding and the zero-padded feature lanes.
    return out[:, :N, :Dv]


def reference_self_attention(x, wq, wk, wv):
    q = x @ wq
    k = x @ wk
    v = x @ wv
    s = jnp.einsum("bnd,bmd->bnm", q, k) / math.sqrt(wq.shape[1])
    p = jax.nn.softmax(s, axis=-1)
    return jnp.einsum("bnm,bmd->bnd", p, v)


if __name__ == "__main__":
    # Small deterministic shapes consistent with the module's forward.
    B, N = 2, 8                       # batch, sequence length
    dim_input, dim_q, dim_v = 32, 16, 16

    key = jax.random.PRNGKey(0)
    kx, kq, kk, kv = jax.random.split(key, 4)

    x = jax.random.normal(kx, (B, N, dim_input), dtype=jnp.float32)
    # nn.Linear(dim_input, dim_out, bias=False) weight is (dim_out, dim_input);
    # we store the transpose (dim_input, dim_out) so the kernel computes x @ W.
    bound = 1.0 / math.sqrt(dim_input)
    wq = jax.random.uniform(kq, (dim_input, dim_q), jnp.float32, -bound, bound)
    wk = jax.random.uniform(kk, (dim_input, dim_q), jnp.float32, -bound, bound)
    wv = jax.random.uniform(kv, (dim_input, dim_v), jnp.float32, -bound, bound)

    ref = reference_self_attention(x, wq, wk, wv)

    # Default: bf16 MXU operands (native MXU rate) with f32 accumulation.
    att = jax.block_until_ready(self_attention(x, wq, wk, wv))
    assert att.shape == (B, N, dim_v)
    assert jnp.allclose(att, ref, atol=2e-2, rtol=2e-2), \
        float(jnp.max(jnp.abs(att - ref)))

    # Full-f32 path (exact reciprocal) matches the reference tightly.
    att32 = jax.block_until_ready(
        self_attention(x, wq, wk, wv, compute_dtype=jnp.float32))
    assert jnp.allclose(att32, ref, atol=1e-5, rtol=1e-5), \
        float(jnp.max(jnp.abs(att32 - ref)))

    print("KERNEL_OK")
</pallas_src>

<mosaic_0001>
module attributes {stable_mosaic.version = 11 : i64} {
  func.func @_qkv_proj_kernel(%arg0: i32, %arg1: i32, %arg2: memref<1x8x32xbf16, #tpu.memory_space<vmem>>, %arg3: memref<32x128xbf16, #tpu.memory_space<vmem>>, %arg4: memref<32x128xbf16, #tpu.memory_space<vmem>>, %arg5: memref<32x128xbf16, #tpu.memory_space<vmem>>, %arg6: memref<1x8x128xbf16, #tpu.memory_space<vmem>>, %arg7: memref<1x8x128xbf16, #tpu.memory_space<vmem>>, %arg8: memref<1x8x128xbf16, #tpu.memory_space<vmem>>) attributes {dimension_semantics = [#tpu.dimension_semantics<parallel>, #tpu.dimension_semantics<parallel>], iteration_bounds = array<i64: 2, 1>, scalar_prefetch = 0 : i64, scratch_operands = 0 : i64, tpu.core_type = #tpu.core_type<tc>, window_params = [{transform_indices = @transform_0, window_bounds = array<i64: 1, 8, 32>}, {pipeline_mode = #tpu.pipeline_mode<synchronous>, transform_indices = @transform_1, window_bounds = array<i64: 32, 128>}, {pipeline_mode = #tpu.pipeline_mode<synchronous>, transform_indices = @transform_2, window_bounds = array<i64: 32, 128>}, {pipeline_mode = #tpu.pipeline_mode<synchronous>, transform_indices = @transform_3, window_bounds = array<i64: 32, 128>}, {transform_indices = @transform_4, window_bounds = array<i64: 1, 8, 128>}, {transform_indices = @transform_5, window_bounds = array<i64: 1, 8, 128>}, {transform_indices = @transform_6, window_bounds = array<i64: 1, 8, 128>}]} {
    %c0 = arith.constant 0 : index
    %c0_0 = arith.constant 0 : index
    %c0_1 = arith.constant 0 : index
    %0 = vector.load %arg2[%c0, %c0_0, %c0_1] : memref<1x8x32xbf16, #tpu.memory_space<vmem>>, vector<1x8x32xbf16>
    %1 = vector.shape_cast %0 : vector<1x8x32xbf16> to vector<8x32xbf16>
    %c0_2 = arith.constant 0 : index
    %c0_3 = arith.constant 0 : index
    %2 = vector.load %arg3[%c0_2, %c0_3] : memref<32x128xbf16, #tpu.memory_space<vmem>>, vector<32x128xbf16>
    %cst = arith.constant dense<0.000000e+00> : vector<8x128xf32>
    %3 = tpu.matmul %1, %2, %cst {dimension_numbers = #tpu.dot_dimension_numbers<[1], [0], [0], [1], [0, 0, 1, 1], [], []>} : vector<8x32xbf16>, vector<32x128xbf16>, vector<8x128xf32> -> vector<8x128xf32>
    %4 = arith.truncf %3 : vector<8x128xf32> to vector<8x128xbf16>
    %c0_4 = arith.constant 0 : index
    %c0_5 = arith.constant 0 : index
    %c0_6 = arith.constant 0 : index
    %5 = vector.load %arg6[%c0_4, %c0_5, %c0_6] : memref<1x8x128xbf16, #tpu.memory_space<vmem>>, vector<1x8x128xbf16>
    %6 = vector.shape_cast %5 : vector<1x8x128xbf16> to vector<8x128xbf16>
    %7 = vector.shape_cast %4 : vector<8x128xbf16> to vector<1x8x128xbf16>
    tpu.vector_store %arg6[%c0_4, %c0_5, %c0_6], %7 {strides = array<i32>} : memref<1x8x128xbf16, #tpu.memory_space<vmem>>, vector<1x8x128xbf16>,
    %c0_7 = arith.constant 0 : index
    %c0_8 = arith.constant 0 : index
    %8 = vector.load %arg4[%c0_7, %c0_8] : memref<32x128xbf16, #tpu.memory_space<vmem>>, vector<32x128xbf16>
    %cst_9 = arith.constant dense<0.000000e+00> : vector<8x128xf32>
    %9 = tpu.matmul %1, %8, %cst_9 {dimension_numbers = #tpu.dot_dimension_numbers<[1], [0], [0], [1], [0, 0, 1, 1], [], []>} : vector<8x32xbf16>, vector<32x128xbf16>, vector<8x128xf32> -> vector<8x128xf32>
    %10 = arith.truncf %9 : vector<8x128xf32> to vector<8x128xbf16>
    %c0_10 = arith.constant 0 : index
    %c0_11 = arith.constant 0 : index
    %c0_12 = arith.constant 0 : index
    %11 = vector.load %arg7[%c0_10, %c0_11, %c0_12] : memref<1x8x128xbf16, #tpu.memory_space<vmem>>, vector<1x8x128xbf16>
    %12 = vector.shape_cast %11 : vector<1x8x128xbf16> to vector<8x128xbf16>
    %13 = vector.shape_cast %10 : vector<8x128xbf16> to vector<1x8x128xbf16>
    tpu.vector_store %arg7[%c0_10, %c0_11, %c0_12], %13 {strides = array<i32>} : memref<1x8x128xbf16, #tpu.memory_space<vmem>>, vector<1x8x128xbf16>,
    %c0_13 = arith.constant 0 : index
    %c0_14 = arith.constant 0 : index
    %14 = vector.load %arg5[%c0_13, %c0_14] : memref<32x128xbf16, #tpu.memory_space<vmem>>, vector<32x128xbf16>
    %cst_15 = arith.constant dense<0.000000e+00> : vector<8x128xf32>
    %15 = tpu.matmul %1, %14, %cst_15 {dimension_numbers = #tpu.dot_dimension_numbers<[1], [0], [0], [1], [0, 0, 1, 1], [], []>} : vector<8x32xbf16>, vector<32x128xbf16>, vector<8x128xf32> -> vector<8x128xf32>
    %16 = arith.truncf %15 : vector<8x128xf32> to vector<8x128xbf16>
    %c0_16 = arith.constant 0 : index
    %c0_17 = arith.constant 0 : index
    %c0_18 = arith.constant 0 : index
    %17 = vector.load %arg8[%c0_16, %c0_17, %c0_18] : memref<1x8x128xbf16, #tpu.memory_space<vmem>>, vector<1x8x128xbf16>
    %18 = vector.shape_cast %17 : vector<1x8x128xbf16> to vector<8x128xbf16>
    %19 = vector.shape_cast %16 : vector<8x128xbf16> to vector<1x8x128xbf16>
    tpu.vector_store %arg8[%c0_16, %c0_17, %c0_18], %19 {strides = array<i32>} : memref<1x8x128xbf16, #tpu.memory_space<vmem>>, vector<1x8x128xbf16>,
    return
  }
  func.func @transform_0(%arg0: i32, %arg1: i32) -> (i32, i32, i32) {
    %c0_i32 = arith.constant 0 : i32
    %c0_i32_0 = arith.constant 0 : i32
    return %arg0, %arg1, %c0_i32 : i32, i32, i32
  }
  func.func @transform_1(%arg0: i32, %arg1: i32) -> (i32, i32) {
    %c0_i32 = arith.constant 0 : i32
    %c0_i32_0 = arith.constant 0 : i32
    %c0_i32_1 = arith.constant 0 : i32
    return %c0_i32, %c0_i32_0 : i32, i32
  }
  func.func @transform_2(%arg0: i32, %arg1: i32) -> (i32, i32) {
    %c0_i32 = arith.constant 0 : i32
    %c0_i32_0 = arith.constant 0 : i32
    %c0_i32_1 = arith.constant 0 : i32
    return %c0_i32, %c0_i32_0 : i32, i32
  }
  func.func @transform_3(%arg0: i32, %arg1: i32) -> (i32, i32) {
    %c0_i32 = arith.constant 0 : i32
    %c0_i32_0 = arith.constant 0 : i32
    %c0_i32_1 = arith.constant 0 : i32
    return %c0_i32, %c0_i32_0 : i32, i32
  }
  func.func @transform_4(%arg0: i32, %arg1: i32) -> (i32, i32, i32) {
    %c0_i32 = arith.constant 0 : i32
    %c0_i32_0 = arith.constant 0 : i32
    return %arg0, %arg1, %c0_i32 : i32, i32, i32
  }
  func.func @transform_5(%arg0: i32, %arg1: i32) -> (i32, i32, i32) {
    %c0_i32 = arith.constant 0 : i32
    %c0_i32_0 = arith.constant 0 : i32
    return %arg0, %arg1, %c0_i32 : i32, i32, i32
  }
  func.func @transform_6(%arg0: i32, %arg1: i32) -> (i32, i32, i32) {
    %c0_i32 = arith.constant 0 : i32
    %c0_i32_0 = arith.constant 0 : i32
    return %arg0, %arg1, %c0_i32 : i32, i32, i32
  }
}

</mosaic_0001>

<bundles_post_ra>
// kernel: tpu_custom_call.1
= control target key start
LH: loop header
LB: loop body
LE: loop exit
PB: predicated region body
PF: predicated region fallthrough
CT: control target
= control target key end

     0   :  { %12 = vsyncpa [#allocation3], 0  ;;  %s1619_s0 = inlined_call_operand.hbm [shape: bf16[2,8,32], index: 0, kind: input, shape index: {}]   ;;  %s1620_s1 = inlined_call_operand.hbm [shape: bf16[32,128], index: 1, kind: input, shape index: {}]   ;;  %s1621_s2 = inlined_call_operand.hbm [shape: bf16[32,128], index: 2, kind: input, shape index: {}]   ;;  %s1622_s3 = inlined_call_operand.hbm [shape: bf16[32,128], index: 3, kind: input, shape index: {}]   ;;  %s1623_s4 = inlined_call_operand.hbm [shape: bf16[2,8,128], index: 4, kind: output, shape index: {0}]   ;;  %s1624_s5 = inlined_call_operand.hbm [shape: bf16[2,8,128], index: 5, kind: output, shape index: {1}]   ;;  %s1625_s6 = inlined_call_operand.hbm [shape: bf16[2,8,128], index: 6, kind: output, shape index: {2}]  }
   0x1   :  { %14 = vsyncpa [#allocation3 + $0x1], 0 }
   0x2   :  { %15 = vsyncpa [#allocation6], 0 }
   0x3   :  { %16 = vsyncpa [#allocation9], 0 }
   0x4   :  { %17 = vsyncpa [#allocation4], 0 }
   0x5   :  { %19 = vsyncpa [#allocation4 + $0x1], 0 }
   0x6   :  { %20 = vsyncpa [#allocation12], 0 }
   0x7   :  { %22 = vsyncpa [#allocation12 + $0x1], 0  ;;  %s1247_s21 = smov 0   ;;  %s1249_s22 = smov 0  }
   0x8   :  { %s1251_s23 = smov 0   ;;  %s1253_s24 = smov 0  }
   0x9   :  { %s1255_s25 = smov 0   ;;  %s1257_s26 = smov 0  }
   0xa LB: > { %1632 = sst [smem:[#allocation19_spill]] %s1179_s21  ;;  %s1278_s27 = sadd.s32 4294967295, %s1199_s26   ;;  %s1199_s26 = sphi %s1257_s26, %s28_s26   ;;  %s1195_s25 = sphi %s1255_s25, %s1658_s25   ;;  %s1191_s24 = sphi %s1253_s24, %s1657_s24   ;;  %s1187_s23 = sphi %s1251_s23, %s1656_s23   ;;  %s1183_s22 = sphi %s1249_s22, %s1655_s22   ;;  %s1179_s21 = sphi %s1247_s21, %s1654_s21  }
   0xb   : > { %s1627_s28 = sadd.s32 4294967294, %s1199_s26   ;;  %p62_p0 = scmp.ne.s32.totalorder %s1183_s22, %s1179_s21 }
   0xc   : > { %p1626_p1 = scmp.eq.s32.totalorder %s1278_s27, 0  ;;  %p157_p3 = scmp.eq.s32.totalorder %s1627_s28, 1 }
   0xd   : > { %p757_p5 = scmp.ge.s32.totalorder %s1199_s26, 1  ;;  %p220_p7 = scmp.lt.s32.totalorder %s1199_s26, 3 }
   0xe   : > { %p1289_p4 = por %p1626_p1, %p62_p0  ;;  %p1294_p6 = por %p157_p3, %p62_p0 }
   0xf   : > { %p1299_p8 = pnand %p757_p5, %p220_p7  ;;  %s1201_s8 = smov [#allocation5]  }
  0x10   : > { %s1633_s29 = scalar_select %p1289_p4, 1, 0 }
  0x11   : > { %s1634_s30 = scalar_select %p1294_p6, 1, 0 }
  0x12   : > { %s1636_s7 = scalar_select %p1299_p8, 1, 0 }
  0x13   : > { %1635 = sst [smem:[#allocation20_spill]] %s1634_s30  ;;  %s232_s9 = sshll.u32 %s1201_s8, 4  ;;  %s1303_s9 = int_to_ptr.vmem [resolvable:$true] %s232_s9 }
  0x14   : > { %p842_p9 = pneg %p1299_p8  ;;  %s1202_s11 = smov [#allocation7]  }
  0x15   : > { %s245_s12 = sshll.u32 %s1202_s11, 4  ;;  %s1203_s13 = smov [#allocation8]   ;;  %s1314_s12 = int_to_ptr.vmem [resolvable:$true] %s245_s12 }
  0x16   : > { %p1310_p11 = pnand %p842_p9, %p1626_p1  ;;  %s1316_s14 = sshll.u32 %s1203_s13, 4  ;;  %s259_s14 = int_to_ptr.vmem [resolvable:$true] %s1316_s14 }
  0x17   : > { %s935_s17 = scalar_lea.hbm %s1620_s1, 256 }
  0x18   : > { %p936_p12 = scmp.ne.s32.totalorder %s1620_s1, %s935_s17  ;;  %p1326_p13 = pneg %p1310_p11 }
  0x19   : > { %p942_p5 = scmp.lt.u32.totalorder %s935_s17, %s1620_s1 }
  0x1a   : > { %p938_p0 = pnand %p1326_p13, %p936_p12 }
  0x1c   : > { %p939_p3 = pneg %p938_p0 }
  0x1e   : > { %p944_p7 = pnand %p942_p5, %p939_p3 }
  0x20   : > { %947 = shalt.err (!%p944_p7)
}
  0x21   : > { %s948_s13 = scalar_lea.vmem %s1303_s9, 256  ;;  %p956_p2 = scmp.lt.s32.totalorder %s1303_s9, %s1303_s9 }
  0x22   : > { %p949_p9 = scmp.ne.s32.totalorder %s1303_s9, %s948_s13  ;;  %p957_p6 = scmp.lt.s32.totalorder %s948_s13, %s948_s13 }
  0x24   : > { %p951_p10 = pnand %p949_p9, %p1326_p13  ;;  %p958_p12 = por %p957_p6, %p956_p2 }
  0x26   : > { %p952_p1 = pneg %p951_p10 }
  0x28   : > { %p959_p0 = pnand %p958_p12, %p952_p1 }
  0x2a   : > { %962 = shalt.err (!%p959_p0)
}
  0x2b   : > { %s1204_s15 = smov 64   ;;  %s1205_s16 = smov 4  }
  0x2c   : > { %845 = dma.hbm_to_vmem [thread:$0]  (!%p1310_p11), %s1620_s1, 256, %s1303_s9, [#allocation6], %s1204_s15, %s1204_s15, %s1205_s16  }
  0x2d   : > { %s963_s11 = scalar_lea.hbm %s1621_s2, 256 }
  0x2e   : > { %p964_p1 = scmp.ne.s32.totalorder %s1621_s2, %s963_s11  ;;  %p970_p10 = scmp.lt.u32.totalorder %s963_s11, %s1621_s2 }
  0x30   : > { %p966_p2 = pnand %p964_p1, %p1326_p13 }
  0x32   : > { %p967_p6 = pneg %p966_p2 }
  0x34   : > { %p972_p3 = pnand %p970_p10, %p967_p6 }
  0x36   : > { %975 = shalt.err (!%p972_p3)
}
  0x37   : > { %s976_s9 = scalar_lea.vmem %s1314_s12, 256  ;;  %p984_p12 = scmp.lt.s32.totalorder %s1314_s12, %s1314_s12 }
  0x38   : > { %p977_p5 = scmp.ne.s32.totalorder %s1314_s12, %s976_s9  ;;  %p985_p0 = scmp.lt.s32.totalorder %s976_s9, %s976_s9 }
  0x3a   : > { %p979_p7 = pnand %p977_p5, %p1326_p13  ;;  %p986_p1 = por %p985_p0, %p984_p12 }
  0x3c   : > { %p980_p9 = pneg %p979_p7 }
  0x3e   : > { %p987_p2 = pnand %p986_p1, %p980_p9 }
  0x40   : > { %990 = shalt.err (!%p987_p2)
}
  0x41   : > { %848 = dma.hbm_to_vmem [thread:$0]  (!%p1310_p11), %s1621_s2, 256, %s1314_s12, [#allocation6], %s1204_s15, %s1204_s15, %s1205_s16  }
  0x42   : > { %s991_s18 = scalar_lea.hbm %s1622_s3, 256 }
  0x43   : > { %p992_p6 = scmp.ne.s32.totalorder %s1622_s3, %s991_s18  ;;  %p998_p5 = scmp.lt.u32.totalorder %s991_s18, %s1622_s3 }
  0x45   : > { %p994_p10 = pnand %p992_p6, %p1326_p13 }
  0x47   : > { %p995_p3 = pneg %p994_p10 }
  0x49   : > { %p1000_p7 = pnand %p998_p5, %p995_p3 }
  0x4b   : > { %1003 = shalt.err (!%p1000_p7)
}
  0x4c   : > { %s1004_s9 = scalar_lea.vmem %s259_s14, 256  ;;  %p1012_p1 = scmp.lt.s32.totalorder %s259_s14, %s259_s14 }
  0x4d   : > { %p1005_p9 = scmp.ne.s32.totalorder %s259_s14, %s1004_s9  ;;  %p1013_p2 = scmp.lt.s32.totalorder %s1004_s9, %s1004_s9 }
  0x4f   : > { %p1007_p12 = pnand %p1005_p9, %p1326_p13  ;;  %p1014_p4 = por %p1013_p2, %p1012_p1 }
  0x51   : > { %p1008_p0 = pneg %p1007_p12 }
  0x53   : > { %p1015_p8 = pnand %p1014_p4, %p1008_p0 }
  0x55   : > { %1018 = shalt.err (!%p1015_p8)
}
  0x56   : > { %851 = dma.hbm_to_vmem [thread:$0]  (!%p1310_p11), %s1622_s3, 256, %s259_s14, [#allocation9], %s1204_s15, %s1204_s15, %s1205_s16  }
  0x57   : > { %s49_s20 = sadd.s32 1, %s1187_s23  ;;  %s40_s10 = sadd.s32 1, %s1195_s25 }
  0x58   : > { %p56_p4 = scmp.ne.s32.totalorder %s1187_s23, %s1183_s22  ;;  %p42_p8 = scmp.ge.s32.totalorder %s40_s10, 2 }
  0x59   : > { %p57_p13 = scmp.eq.s32.totalorder %s1199_s26, 0  ;;  %p1639_p6 = scmp.eq.s32.totalorder %s1278_s27, 1 }
  0x5a   : > { %p869_p3 = scmp.lt.s32.totalorder %s1199_s26, 2  ;;  %s1660_s10 = smov (%p42_p8, %s40_s10), 0 }
  0x5b   : > { %p1405_p10 = por %p1639_p6, %p56_p4  ;;  %p58_p5 = por %p57_p13, %p56_p4 }
  0x5c   : > { %s272_s30 = sand.u32 1, %s1187_s23   ;;  %s44_s17 = ssub.s32 %s1195_s25, %s1660_s10 }
  0x5d   : > { %p47_p7 = scmp.eq.s32.totalorder %s44_s17, 0  ;;  %s762_s14 = sshll.u32 %s272_s30, 2 }
  0x5e   : > { %s763_s15 = sshll.u32 %s1195_s25, 6  ;;  %s276_s11 = scalar_lea.vmem [#allocation2], %s762_s14 }
  0x5f   : > { %s1417_s16 = scalar_select %p47_p7, %s1187_s23, %s49_s20  }
  0x60   : > { %s1422_s8 = scalar_lea.hbm %s1619_s0, %s763_s15  ;;  %s284_s13 = sshll.u32 %s276_s11, 4  ;;  %s1424_s13 = int_to_ptr.vmem [resolvable:$true] %s284_s13 }
  0x61   : > { %p1428_p11 = pnand %p869_p3, %p58_p5  ;;  %s273_s12 = scalar_lea.sflag [#allocation3], %s272_s30 }
  0x62   : > { %s1019_s21 = scalar_lea.hbm %s1422_s8, 64  ;;  %s1024_s14 = scalar_lea.hbm %s1619_s0, 128 }
  0x63   : > { %p1020_p9 = scmp.ne.s32.totalorder %s1422_s8, %s1019_s21  ;;  %p1021_p12 = pneg %p1428_p11 }
  0x64   : > { %p1025_p2 = scmp.lt.u32.totalorder %s1422_s8, %s1619_s0  ;;  %p1026_p4 = scmp.lt.u32.totalorder %s1024_s14, %s1019_s21 }
  0x65   : > { %p1022_p0 = pnand %p1021_p12, %p1020_p9  ;;  %p1028_p13 = scmp.lt.u32.totalorder %s1019_s21, %s1422_s8 }
  0x66   : > { %p1027_p8 = por %p1026_p4, %p1025_p2 }
  0x67   : > { %p1023_p1 = pneg %p1022_p0 }
  0x68   : > { %p1029_p6 = por %p1028_p13, %p1027_p8 }
  0x6a   : > { %p1030_p3 = pnand %p1029_p6, %p1023_p1 }
  0x6c   : > { %1033 = shalt.err (!%p1030_p3)
}
  0x6d   : > { %s1034_s30 = scalar_lea.vmem %s1424_s13, 64  ;;  %s1206_s19 = smov [#allocation2]  }
  0x6e   : > { %p1035_p5 = scmp.ne.s32.totalorder %s1424_s13, %s1034_s30  ;;  %s1039_s11 = sshll.u32 %s1206_s19, 4  ;;  %s1040_s11 = int_to_ptr.vmem [resolvable:$false] %s1039_s11 }
  0x6f   : > { %s1041_s20 = scalar_lea.vmem %s1040_s11, 128  ;;  %p1042_p0 = scmp.lt.s32.totalorder %s1424_s13, %s1040_s11 }
  0x70   : > { %p1037_p7 = pnand %p1035_p5, %p1021_p12  ;;  %p1043_p2 = scmp.lt.s32.totalorder %s1041_s20, %s1034_s30 }
  0x72   : > { %p1038_p9 = pneg %p1037_p7  ;;  %p1044_p4 = por %p1043_p2, %p1042_p0 }
  0x74   : > { %p1045_p8 = pnand %p1044_p4, %p1038_p9 }
  0x76   : > { %1048 = shalt.err (!%p1045_p8)
}
  0x77   : > { %855 = dma.hbm_to_vmem [thread:$0]  (!%p1428_p11), %s1422_s8, 64, %s1424_s13, %s273_s12  }
  0x78   : > { %p1642_p1 = scmp.ne.s32.totalorder %s1636_s7, 0 }
  0x79   : > { %s1460_s21 = sand.u32 (!%p1642_p1), 1, %s1183_s22   ;;  %p1643_p12 = scmp.ne.s32.totalorder (!%p1642_p1), %s1633_s29, 0 }
  0x7a   : > { %293 = sbr.rel (%p1642_p1) target bundleno = 428 (0x1ac), region = 36  ;;  %s1463_s17 = sshll.u32 (!%p1642_p1), %s1460_s21, 2 }
  0x7b   : > { %s296_s14 = scalar_lea.sflag (!%p1642_p1), [#allocation3], %s1460_s21  ;;  %s299_s15 = scalar_lea.vmem (!%p1642_p1), [#allocation2], %s1463_s17 }
  0x81   : > { %1158 = dma.done.wait (%p1643_p12), %s296_s14, 64  }
  0x82   : > { %1160 = vsyncadd (%p1643_p12), %s296_s14, 4294967232  ;;  %p1644_p11 = scmp.eq.s32.totalorder %s1278_s27, 0 }
  0x84   : > { %1162 = dma.done.wait (%p1644_p11), [#allocation6], 512   ;;  %p1645_p13 = pmov %p1644_p11 }
  0x85   : > { %p1646_p6 = pmov %p1644_p11 }
  0x86   : > { %1164 = vsyncadd (%p1645_p13), [#allocation6], 4294966784 }
  0x87   : > { %1166 = dma.done.wait (%p1646_p6), [#allocation9], 256   ;;  %p1647_p3 = pmov %p1646_p6 }
  0x88   : > { %v1207_v0 = vmov 0.0   ;;  %vm1208_vm0 = vmmov 0   ;;  %v929_v1 = vld [vmem:[#allocation5] sm:$0xff]   ;;  %v930_v2 = vld [vmem:[#allocation5 + $0x8] sm:$0xff]   ;;  %v931_v3 = vld [vmem:[#allocation7] sm:$0xff]   ;;  %vm368_vm1 = vcmask 261120  }
  0x89   : > { %1168 = vsyncadd (%p1647_p3), [#allocation9], 4294967040  ;;  %798 = vmatprep.subr.bf16.mxu0 %v1207_v0  ;;  %806 = vmatprep.subr.bf16.mxu1 %v1207_v0  ;;  %v933_v4 = vld [vmem:[#allocation7 + $0x8] sm:$0xff]   ;;  %v932_v6 = vld [vmem:[#allocation8] sm:$0xff]   ;;  %s1483_s29 = sshll.u32 %s1191_s24, 6  ;;  %s335_s7 = scalar_lea.vmem [#allocation10], %s1463_s17 }
  0x8a   : > { %802 = vmatprep.mubr.msk.bf16.mxu0 %vm1208_vm0, %v1207_v0  ;;  %810 = vmatprep.mubr.msk.bf16.mxu1 %vm1208_vm0, %v1207_v0  ;;  %v351_v5 = vld [vmem:[%s299_s15] sm:$0xf]  ;;  %v934_v7 = vld [vmem:[#allocation8 + $0x8] sm:$0xff]   ;;  %s555_s8 = sshll.u32 %s335_s7, 4  ;;  %s342_s9 = scalar_lea.vmem [#allocation11], %s1463_s17  ;;  %s1496_s8 = int_to_ptr.vmem [resolvable:$true] %s555_s8 }
  0x8b   : > { %799 = vmatpush3.bf16.msra.mxu0 %v929_v1  ;;  %807 = vmatpush3.bf16.msra.mxu1 %v931_v3  ;;  %s569_s12 = sshll.u32 %s342_s9, 4  ;;  %s1494_s19 = scalar_lea.hbm %s1623_s4, %s1483_s29  ;;  %s1504_s12 = int_to_ptr.vmem [resolvable:$true] %s569_s12 }
  0x8c   : > { %800 = vmatprep.subr.bf16.mxu0 %v1207_v0  ;;  %808 = vmatprep.subr.bf16.mxu1 %v1207_v0  ;;  %s1502_s20 = scalar_lea.hbm %s1624_s5, %s1483_s29  ;;  %s531_s14 = scalar_lea.sflag [#allocation4], %s1460_s21 }
  0x8d   : > { %s1049_s15 = scalar_lea.vmem %s1496_s8, 64  ;;  %s1209_s18 = smov [#allocation10]  }
  0x8e   : > { %p1050_p5 = scmp.ne.s32.totalorder %s1496_s8, %s1049_s15 }
  0x8f   : > { %801 = vmatpush3.bf16.msra.mxu0 %v930_v2  ;;  %809 = vmatpush3.bf16.msra.mxu1 %v933_v4 }
  0x90   : > { %814 = vmatprep.subr.bf16.mxu0 %v1207_v0  ;;  %p1051_p7 = pnand %p1050_p5, %p1405_p10 }
  0x92   : > { %803 = vmatmul.mubr.msk.bf16.vlgmr.msra.gmra.mrb[0].mxu0 %vm368_vm1, %v351_v5  ;;  %811 = vmatmul.mubr.msk.bf16.vlgmr.msra.gmra.mrb[0].mxu1 %vm368_vm1, %v351_v5  ;;  %p1052_p9 = pneg %p1051_p7 }
  0x93   : > { %815 = vmatpush3.bf16.msra.mxu0 %v932_v6  ;;  %818 = vmatprep.mubr.msk.bf16.mxu0 %vm1208_vm0, %v1207_v0 }
  0x94   : > { %816 = vmatprep.subr.bf16.mxu0 %v1207_v0 }
  0x97   : > { %817 = vmatpush3.bf16.msra.mxu0 %v934_v7 }
  0x9a   : > { %819 = vmatmul.mubr.msk.bf16.vlgmr.msra.gmra.mrb[4].mxu0 %vm368_vm1, %v351_v5 }
 0x165   : > { %v406_v8 = vpop.f32.mrb[0].mxu0  ;;  %v464_v12 = vpop.f32.mrb[0].mxu1 }
 0x166   : > { %v412_v9 = vpack.c.bf16 %v406_v8, %v406_v8  ;;  %v804_v10 = vpop.f32.mrb[1].mxu0  ;;  %v470_v14 = vpack.c.bf16 %v464_v12, %v464_v12  ;;  %v812_v15 = vpop.f32.mrb[1].mxu1 }
 0x167   : > { %v409_v11 = vpop.f32.mrb[2].mxu0  ;;  %v467_v16 = vpop.f32.mrb[2].mxu1 }
 0x168   : > { %413 = vst [vmem:[%s335_s7] sm:$0xf] %v412_v9  ;;  %v805_v13 = vpop.f32.mrb[3].mxu0  ;;  %s1053_s7 = sshll.u32 %s1209_s18, 4  ;;  %s1054_s7 = int_to_ptr.vmem [resolvable:$false] %s1053_s7 }
 0x169   : > { %s1055_s30 = scalar_lea.vmem %s1054_s7, 128  ;;  %p1056_p0 = scmp.lt.s32.totalorder %s1496_s8, %s1054_s7 }
 0x16a   : > { %p1057_p2 = scmp.lt.s32.totalorder %s1055_s30, %s1049_s15 }
 0x16c   : > { %p1058_p4 = por %p1057_p2, %p1056_p0 }
 0x16e   : > { %p1059_p8 = pnand %p1058_p4, %p1052_p9 }
 0x170   : > { %1062 = shalt.err (!%p1059_p8)
}
 0x171   : > { %s1063_s21 = scalar_lea.hbm %s1494_s19, 64  ;;  %s1067_s18 = scalar_lea.hbm %s1623_s4, 128 }
 0x172   : > { %p1064_p1 = scmp.ne.s32.totalorder %s1494_s19, %s1063_s21  ;;  %p1068_p13 = scmp.lt.u32.totalorder %s1494_s19, %s1623_s4 }
 0x173   : > { %p1069_p6 = scmp.lt.u32.totalorder %s1067_s18, %s1063_s21  ;;  %p1071_p5 = scmp.lt.u32.totalorder %s1063_s21, %s1494_s19 }
 0x174   : > { %p1065_p12 = pnand %p1064_p1, %p1405_p10 }
 0x175   : > { %p1070_p3 = por %p1069_p6, %p1068_p13 }
 0x176   : > { %p1066_p11 = pneg %p1065_p12 }
 0x177   : > { %p1072_p7 = por %p1071_p5, %p1070_p3 }
 0x179   : > { %p1073_p9 = pnand %p1072_p7, %p1066_p11 }
 0x17b   : > { %1076 = shalt.err (!%p1073_p9)
}
 0x17c   : > { %836 = dma.vmem_to_hbm [thread:$0]  (%p1405_p10), %s1496_s8, 64, %s1494_s19, %s531_s14   ;;  %471 = vst [vmem:[%s342_s9] sm:$0xf] %v470_v14  ;;  %v813_v17 = vpop.f32.mrb[3].mxu1 }
 0x17d   : > { %s349_s13 = scalar_lea.vmem [#allocation13], %s1463_s17  ;;  %s1648_s30 = sand.u32 1, %s1278_s27  }
 0x17e   : > { %s1533_s15 = sshll.u32 %s349_s13, 4  ;;  %s1537_s21 = scalar_lea.sflag [#allocation12], %s1648_s30  ;;  %s1568_s15 = int_to_ptr.vmem [resolvable:$true] %s1533_s15 }
 0x17f   : > { %s1077_s24 = scalar_lea.vmem %s1504_s12, 64  ;;  %s1210_s11 = smov [#allocation11]  }
 0x180   : > { %p1078_p0 = scmp.ne.s32.totalorder %s1504_s12, %s1077_s24  ;;  %s1081_s18 = sshll.u32 %s1210_s11, 4  ;;  %s1082_s18 = int_to_ptr.vmem [resolvable:$false] %s1081_s18 }
 0x181   : > { %s1083_s7 = scalar_lea.vmem %s1082_s18, 128  ;;  %p1084_p8 = scmp.lt.s32.totalorder %s1504_s12, %s1082_s18 }
 0x182   : > { %p1079_p2 = pnand %p1078_p0, %p1405_p10  ;;  %p1085_p1 = scmp.lt.s32.totalorder %s1083_s7, %s1077_s24 }
 0x184   : > { %p1080_p4 = pneg %p1079_p2  ;;  %p1086_p12 = por %p1085_p1, %p1084_p8 }
 0x186   : > { %p1087_p11 = pnand %p1086_p12, %p1080_p4 }
 0x188   : > { %1090 = shalt.err (!%p1087_p11)
}
 0x189   : > { %s1091_s27 = scalar_lea.hbm %s1502_s20, 64  ;;  %s1095_s19 = scalar_lea.hbm %s1624_s5, 128 }
 0x18a   : > { %p1092_p13 = scmp.ne.s32.totalorder %s1502_s20, %s1091_s27  ;;  %p1096_p5 = scmp.lt.u32.totalorder %s1502_s20, %s1624_s5 }
 0x18b   : > { %p1097_p7 = scmp.lt.u32.totalorder %s1095_s19, %s1091_s27  ;;  %p1099_p0 = scmp.lt.u32.totalorder %s1091_s27, %s1502_s20 }
 0x18c   : > { %p1093_p6 = pnand %p1092_p13, %p1405_p10 }
 0x18d   : > { %p1098_p9 = por %p1097_p7, %p1096_p5 }
 0x18e   : > { %p1094_p3 = pneg %p1093_p6 }
 0x18f   : > { %p1100_p2 = por %p1099_p0, %p1098_p9 }
 0x191   : > { %p1101_p4 = pnand %p1100_p2, %p1094_p3 }
 0x193   : > { %1104 = shalt.err (!%p1101_p4)
}
 0x194   : > { %837 = dma.vmem_to_hbm [thread:$0]  (%p1405_p10), %s1504_s12, 64, %s1502_s20, %s1537_s21   ;;  %v522_v18 = vpop.f32.mrb[4].mxu0 }
 0x195   : > { %v528_v19 = vpack.c.bf16 %v522_v18, %v522_v18  ;;  %v820_v20 = vpop.f32.mrb[5].mxu0  ;;  %s1565_s18 = scalar_lea.hbm %s1625_s6, %s1483_s29  ;;  %s1105_s7 = scalar_lea.vmem %s1568_s15, 64 }
 0x196   : > { %v525_v21 = vpop.f32.mrb[6].mxu0  ;;  %p1106_p8 = scmp.ne.s32.totalorder %s1568_s15, %s1105_s7  ;;  %s1211_s12 = smov [#allocation13]  }
 0x197   : > { %529 = vst [vmem:[%s349_s13] sm:$0xf] %v528_v19  ;;  %v821_v22 = vpop.f32.mrb[7].mxu0  ;;  %s1109_s20 = sshll.u32 %s1211_s12, 4  ;;  %s1110_s20 = int_to_ptr.vmem [resolvable:$false] %s1109_s20 }
 0x198   : > { %p1107_p1 = pnand %p1106_p8, %p1405_p10  ;;  %s1111_s27 = scalar_lea.vmem %s1110_s20, 128 }
 0x199   : > { %p1112_p11 = scmp.lt.s32.totalorder %s1568_s15, %s1110_s20  ;;  %p1113_p13 = scmp.lt.s32.totalorder %s1111_s27, %s1105_s7 }
 0x19a   : > { %p1108_p12 = pneg %p1107_p1 }
 0x19b   : > { %p1114_p6 = por %p1113_p13, %p1112_p11 }
 0x19d   : > { %p1115_p3 = pnand %p1114_p6, %p1108_p12 }
 0x19f   : > { %1118 = shalt.err (!%p1115_p3)
}
 0x1a0   : > { %s1119_s17 = scalar_lea.hbm %s1565_s18, 64  ;;  %s1123_s8 = scalar_lea.hbm %s1625_s6, 128 }
 0x1a1   : > { %p1120_p5 = scmp.ne.s32.totalorder %s1565_s18, %s1119_s17  ;;  %p1124_p0 = scmp.lt.u32.totalorder %s1565_s18, %s1625_s6 }
 0x1a2   : > { %p1125_p2 = scmp.lt.u32.totalorder %s1123_s8, %s1119_s17  ;;  %p1127_p8 = scmp.lt.u32.totalorder %s1119_s17, %s1565_s18 }
 0x1a3   : > { %p1121_p7 = pnand %p1120_p5, %p1405_p10 }
 0x1a4   : > { %p1126_p4 = por %p1125_p2, %p1124_p0 }
 0x1a5   : > { %p1122_p9 = pneg %p1121_p7 }
 0x1a6   : > { %p1128_p1 = por %p1127_p8, %p1126_p4 }
 0x1a8   : > { %p1129_p12 = pnand %p1128_p1, %p1122_p9 }
 0x1aa   : > { %1132 = shalt.err (!%p1129_p12)
}
 0x1ab   : > { %838 = dma.vmem_to_hbm [thread:$0]  (%p1405_p10), %s1568_s15, 64, %s1565_s18, %s1537_s21  }
 0x1ac PF: > { %s1649_s14 = sld [smem:[#allocation19_spill]]  ;;  %s1650_s30 = sld [smem:[#allocation20_spill]] }
 0x1ad   : > { %p1652_p13 = scmp.ge.s32.totalorder %s1199_s26, 2 }
 0x1b2   : > { %s595_s24 = sand.u32 1, %s1649_s14   ;;  %p1651_p11 = scmp.ne.s32.totalorder %s1650_s30, 0 }
 0x1b3   : > { %s596_s11 = scalar_lea.sflag [#allocation4], %s595_s24 }
 0x1b4   : > { %p857_p6 = pnand %p1652_p13, %p1651_p11 }
 0x1b6   : > { %1170 = dma.done.wait (!%p857_p6), %s596_s11, 64  }
 0x1b7   : > { %1172 = vsyncadd (!%p857_p6), %s596_s11, 4294967232  ;;  %s1653_s7 = sadd.s32 4294967294, %s1199_s26  }
 0x1b8   : > { %s604_s12 = sand.u32 1, %s1653_s7  }
 0x1b9   : > { %s605_s20 = scalar_lea.sflag [#allocation12], %s604_s12 }
 0x1ba   : > { %1174 = dma.done.wait (!%p857_p6), %s605_s20, 128  }
 0x1bb   : > { %1176 = vsyncadd (!%p857_p6), %s605_s20, 4294967168  ;;  %s28_s26 = sadd.s32 1, %s1199_s26   ;;  %s1654_s21 = smov %s1183_s22 }
 0x1bc   : > { %p25_p10 = scmp.ge.s32.totalorder %s28_s26, 4   ;;  %s1655_s22 = smov %s1187_s23 }
 0x1bd   : > { %s1656_s23 = smov %s1417_s16  ;;  %s1657_s24 = smov %s1195_s25 }
 0x1be   : > { %s1658_s25 = smov %s1660_s10  ;;  %27 = sbr.rel (!%p25_p10) target bundleno = 10 (0xa), region = 125 }
 0x1c5   :  { %619 = vsyncpa [#allocation3], 1 }
 0x1c6   :  { %621 = vsyncpa [#allocation3 + $0x1], 1 }
 0x1c7   :  { %622 = vsyncpa [#allocation6], 1 }
 0x1c8   :  { %623 = vsyncpa [#allocation9], 1 }
 0x1c9   :  { %624 = vsyncpa [#allocation4], 1 }
 0x1ca   :  { %626 = vsyncpa [#allocation4 + $0x1], 1 }
 0x1cb   :  { %627 = vsyncpa [#allocation12], 1 }
 0x1cc   :  { %629 = vsyncpa [#allocation12 + $0x1], 1 }

</bundles_post_ra>
